<compile_context>
chip_gen: v7x
topology: tpu7x:2x2x1
jax: 0.10.0
libtpu: 0.0.40
codegen_flags: <defaults>
</compile_context>

<pallas_src>
import functools

import jax
import jax.numpy as jnp
from jax import lax
from jax.experimental import pallas as pl
from jax.experimental.pallas import tpu as pltpu


def _vmem_budget_bytes():
    """~85% of this generation's per-core VMEM (conservative 64 MiB fallback)."""
    try:
        cap = int(pltpu.get_tpu_info().vmem_capacity_bytes)
    except Exception:
        cap = 64 * 2**20
    return int(cap * 0.85)


def _pick_tiles(N, Ho, wo_cout):
    """Jointly pick (nb, tile_ho).

    Goals (perf review):
      * rows-per-matmul = nb*tile_ho as large as possible up to a vreg-friendly
        target (the f32 accumulator lives in vregs: rows*wo_cout <= ~16K elems),
      * keep >= 2 total grid steps so both v7x TensorCores get work,
      * prefer growing tile_ho over nb (keeps the batch axis parallel),
      * fewer grid steps to amortise the ~0.35 us per-step overhead.
    """
    target_rows = min(256, max(8, 16384 // max(wo_cout, 1)))
    ho_cands = [d for d in range(8, Ho + 1, 8) if Ho % d == 0] or [Ho]
    nb_cands = [d for d in range(1, N + 1) if N % d == 0]
    best, best_key = None, None
    for tho in ho_cands:
        for nb in nb_cands:
            rows = nb * tho
            steps = (N // nb) * (Ho // tho)
            key = (steps >= 2,                      # both v7x TCs get work
                   min(rows, target_rows),          # fill the MXU rows
                   -max(0, rows - target_rows),     # ...without blowing vregs
                   -steps,                          # amortise per-step overhead
                   tho)                             # prefer tile_ho over nb
            if best_key is None or key > best_key:
                best, best_key = (nb, tho), key
    return best


def _conv_block_kernel(x_ref, w_ref, b_ref, o_ref, *,
                       K, stride, dilation, nb, tile_ho, band_al,
                       wp_cin, wo_cout, act):
    """Grid step (b, r): one batch tile x one output-row band.

    x_ref: (nb, Hp2, Wp*Cin)      folded, zero-padded input (bf16)
    w_ref: (K, Wp*Cin, Wo*Cout)   banded weights (bf16), resident
    b_ref: (1, Wo*Cout)           bias tiled across Wo (f32)
    o_ref: (nb, tile_ho, Wo*Cout) lane-dense output tile
    """
    rows = nb * tile_ho
    # f32 accumulator lives in vregs; starting from the tiled bias fuses the
    # bias add for free.  No VMEM scratch, single output store at the end.
    acc = jnp.broadcast_to(b_ref[...], (rows, wo_cout))

    row_step = tile_ho * stride
    row0 = pl.program_id(1) * row_step
    if row_step % 8 == 0:
        row0 = pl.multiple_of(row0, 8)

    if stride == 1:
        # One aligned dynamic load of the halo'd row band; per-tap slicing is
        # static and contiguous.  bf16 slices feed the MXU directly.
        xband = x_ref[:, pl.ds(row0, band_al), :]
        for kh in range(K):   # K (not K*K) MXU matmuls; kw/dilation live in w_ref
            h0 = kh * dilation
            sl = xband[:, h0:h0 + tile_ho, :]
            acc = acc + jnp.dot(sl.reshape(rows, wp_cin), w_ref[kh],
                                preferred_element_type=jnp.float32)
    else:
        # stride >= 2: per-tap sublane-strided ref loads pull only the rows
        # each tap actually uses (no wide band load + strided value slice).
        for kh in range(K):
            sl = x_ref[:, pl.ds(row0 + kh * dilation, tile_ho, stride=stride), :]
            acc = acc + jnp.dot(sl.reshape(rows, wp_cin), w_ref[kh],
                                preferred_element_type=jnp.float32)

    if act == 'relu':
        acc = jnp.maximum(acc, 0.0)
    elif act == 'lrelu':
        acc = jnp.where(acc >= 0.0, acc, 0.1 * acc)     # nn.LeakyReLU(0.1)
    o_ref[...] = acc.reshape(nb, tile_ho, wo_cout).astype(o_ref.dtype)


def prepare_conv_block_params(weight_oihw, bias, *, H, W, stride=1, dilation=1,
                              mxu_dtype=jnp.bfloat16):
    """Weight/bias layout glue — pure relayout, zero numerics impact.

    Hoist this out of the per-step forward path and reuse across calls with
    the same weights & image geometry (perf-review item: the banded-weight
    einsum is a full extra HBM pass if rebuilt every call).
    """
    Cout, Cin, K, K2 = weight_oihw.shape
    assert K == K2
    pad = (K - 1) * dilation // 2
    Ho = (H + 2 * pad - dilation * (K - 1) - 1) // stride + 1
    Wo = (W + 2 * pad - dilation * (K - 1) - 1) // stride + 1
    Hp, Wp = H + 2 * pad, W + 2 * pad
    wp_cin, wo_cout = Wp * Cin, Wo * Cout

    # Banded weights: W_banded[kh, wi*Cin+ci, wo*Cout+co] = w[kh,kw,ci,co] when
    # wi == wo*stride + kw*dilation (else 0).  Folds the kw taps, W-stride and
    # W-dilation into a single lane-dense matmul per kh.
    w_hwio = jnp.transpose(weight_oihw, (2, 3, 1, 0)).astype(jnp.float32)
    wi = jnp.arange(Wp)
    wo = jnp.arange(Wo)
    kw = jnp.arange(K)
    sel = (wi[None, :, None] ==
           (wo[None, None, :] * stride + kw[:, None, None] * dilation)
           ).astype(jnp.float32)                                    # (K, Wp, Wo)
    w_banded = jnp.einsum('kvw,hkio->hviwo', sel, w_hwio)           # (K,Wp,Cin,Wo,Cout)
    w_banded = w_banded.reshape(K, wp_cin, wo_cout).astype(mxu_dtype)

    bias_fold = jnp.tile(bias.astype(jnp.float32), Wo).reshape(1, wo_cout)

    geom = dict(Cin=Cin, Cout=Cout, K=K, pad=pad, Ho=Ho, Wo=Wo, Hp=Hp, Wp=Wp,
                wp_cin=wp_cin, wo_cout=wo_cout, stride=stride,
                dilation=dilation, mxu_dtype=mxu_dtype)
    return w_banded, bias_fold, geom


def conv_block_forward(x_nchw, weight_oihw, bias, *, stride=1, dilation=1,
                       act='relu', norm='none', mxu_dtype=jnp.bfloat16,
                       params=None):
    """Forward pass of ConvBlock(in_c, out_c, K, act, norm, stride, dilation)."""
    N, Cin, H, W = x_nchw.shape
    Cout, Cin_w, K_, _ = weight_oihw.shape
    assert Cin_w == Cin
    if norm not in (None, 'none'):
        # TODO(synk): norm='bn' maps to nn.BatchNorm2d() with no num_features,
        # which is invalid in the reference module itself; only 'none' here.
        raise NotImplementedError("only norm='none' is supported")
    if act not in ('relu', 'lrelu', 'none', None):
        raise ValueError(f"unknown act {act!r}")

    if params is None:
        params = prepare_conv_block_params(weight_oihw, bias, H=H, W=W,
                                           stride=stride, dilation=dilation,
                                           mxu_dtype=mxu_dtype)
    w_banded, bias_fold, g = params
    K, Ho, Wo, Hp, Wp = g['K'], g['Ho'], g['Wo'], g['Hp'], g['Wp']
    wp_cin, wo_cout, pad = g['wp_cin'], g['wo_cout'], g['pad']

    nb, tile_ho = _pick_tiles(N, Ho, wo_cout)
    n_row_tiles = Ho // tile_ho
    row_step = tile_ho * stride
    band_rows = (tile_ho - 1) * stride + (K - 1) * dilation + 1
    band_al = ((band_rows + 7) // 8) * 8          # aligned in-kernel band load
    Hp2 = max(Hp, (n_row_tiles - 1) * row_step + band_al)

    # ------------- generation-aware VMEM budget & feasibility guards ---------
    budget = _vmem_budget_bytes()
    bpe_in = jnp.dtype(mxu_dtype).itemsize
    bpe_out = jnp.dtype(x_nchw.dtype).itemsize
    w_bytes = K * wp_cin * wo_cout * bpe_in              # single-buffered
    x_bufs = 1 if n_row_tiles > 1 else 2                 # single-buffer x when reused
    x_bytes = x_bufs * nb * Hp2 * wp_cin * bpe_in
    if w_bytes > budget // 3 or x_bytes > budget // 2:
        # TODO(synk): large-channel / large-image regime needs a per-tap
        # Cin*K-contraction formulation with halo'd row-band DMA
        # (memory_space=pl.ANY + pltpu.make_async_copy) instead of the
        # banded-weight fold / full-height input block.
        raise NotImplementedError(
            "ConvBlock Pallas kernel: banded-weight / full-height-input "
            "formulation would exceed VMEM for this shape")

    est = (x_bytes
           + 2 * nb * tile_ho * wo_cout * bpe_out        # output block (x2 buffers)
           + w_bytes                                     # banded weights
           + wo_cout * 4)                                # bias
    vmem_limit = int(min(budget, max(32 * 2**20, 3 * est)))

    # ------------- input layout glue (no conv compute here) ------------------
    # NCHW -> NHWC, zero pad spatially (+ extra bottom rows so every aligned
    # in-kernel band load stays in bounds), fold (Wp, Cin) into the lane axis.
    x_nhwc = jnp.transpose(x_nchw, (0, 2, 3, 1))
    x_pad = jnp.pad(x_nhwc, ((0, 0), (pad, pad + (Hp2 - Hp)), (pad, pad), (0, 0)))
    x_fold = x_pad.reshape(N, Hp2, wp_cin).astype(mxu_dtype)

    kernel = functools.partial(
        _conv_block_kernel, K=K, stride=stride, dilation=dilation, nb=nb,
        tile_ho=tile_ho, band_al=band_al, wp_cin=wp_cin, wo_cout=wo_cout,
        act=act)

    def _call(single_buffer):
        def spec(shape, index_map, sbuf):
            if single_buffer and sbuf:
                return pl.BlockSpec(shape, index_map, pipeline_mode=pl.Buffered(1))
            return pl.BlockSpec(shape, index_map)
        return pl.pallas_call(
            kernel,
            out_shape=jax.ShapeDtypeStruct((N, Ho, wo_cout), x_nchw.dtype),
            grid_spec=pltpu.PrefetchScalarGridSpec(
                num_scalar_prefetch=0,
                grid=(N // nb, n_row_tiles),
                in_specs=[
                    # input block: single-buffered when reused across the r axis
                    spec((nb, Hp2, wp_cin), lambda b, r: (b, 0, 0),
                         sbuf=(n_row_tiles > 1)),
                    # grid-invariant operands: single-buffered
                    spec((K, wp_cin, wo_cout), lambda b, r: (0, 0, 0), sbuf=True),
                    spec((1, wo_cout), lambda b, r: (0, 0), sbuf=True),
                ],
                out_specs=pl.BlockSpec((nb, tile_ho, wo_cout),
                                       lambda b, r: (b, r, 0)),
            ),
            compiler_params=pltpu.CompilerParams(
                dimension_semantics=("parallel", "parallel"),
                vmem_limit_bytes=vmem_limit),
        )(x_fold, w_banded, bias_fold)

    try:
        out_fold = jax.block_until_ready(_call(single_buffer=True))
    except Exception:
        # Fall back to default double-buffering if pl.Buffered(1) is rejected
        # by this runtime (numerically identical, slightly more VMEM).
        out_fold = _call(single_buffer=False)

    out_nhwc = out_fold.reshape(N, Ho, Wo, Cout)
    return jnp.transpose(out_nhwc, (0, 3, 1, 2))   # back to NCHW


def _reference_forward(x_nchw, weight_oihw, bias, *, stride, dilation, act):
    pad = (weight_oihw.shape[2] - 1) * dilation // 2
    out = lax.conv_general_dilated(
        x_nchw, weight_oihw,
        window_strides=(stride, stride),
        padding=((pad, pad), (pad, pad)),
        rhs_dilation=(dilation, dilation),
        dimension_numbers=('NCHW', 'OIHW', 'NCHW'),
    ) + bias[None, :, None, None]
    if act == 'relu':
        out = jnp.maximum(out, 0.0)
    elif act == 'lrelu':
        out = jnp.where(out >= 0.0, out, 0.1 * out)
    return out


if __name__ == "__main__":
    # ConvBlock(in_channel=4, out_channel=8, kernel_size=3, act=..., norm='none')
    N, Cin, H, W = 2, 4, 16, 16
    Cout, K = 8, 3
    stride, dilation = 1, 1

    key = jax.random.PRNGKey(0)
    kx, kw_, kb = jax.random.split(key, 3)
    x = jax.random.normal(kx, (N, Cin, H, W), dtype=jnp.float32)
    fan_in = Cin * K * K
    bound = 1.0 / (fan_in ** 0.5)  # matches PyTorch Conv2d default init scale
    weight = jax.random.uniform(kw_, (Cout, Cin, K, K), jnp.float32, -bound, bound)
    bias = jax.random.uniform(kb, (Cout,), jnp.float32, -bound, bound)

    # Weight-layout glue hoisted out of the per-call path (reused for both acts).
    params = prepare_conv_block_params(weight, bias, H=H, W=W,
                                       stride=stride, dilation=dilation)

    for act in ('relu', 'lrelu'):
        out = conv_block_forward(x, weight, bias, stride=stride,
                                 dilation=dilation, act=act, norm='none',
                                 params=params)
        out = jax.block_until_ready(out)
        ref = _reference_forward(x, weight, bias, stride=stride,
                                 dilation=dilation, act=act)
        assert out.shape == ref.shape == (N, Cout, H, W)
        # bf16 MXU operands (f32 accumulation) => bf16-appropriate tolerance.
        assert jnp.allclose(out, ref, atol=5e-2, rtol=5e-2), \
            f"Pallas ConvBlock mismatch vs reference (act={act})"

    print("KERNEL_OK")
</pallas_src>

<mosaic_0001>
module attributes {stable_mosaic.version = 11 : i64} {
  func.func @_conv_block_kernel(%arg0: i32, %arg1: i32, %arg2: memref<1x24x72xbf16, #tpu.memory_space<vmem>>, %arg3: memref<3x72x128xbf16, #tpu.memory_space<vmem>>, %arg4: memref<1x128xf32, #tpu.memory_space<vmem>>, %arg5: memref<1x16x128xf32, #tpu.memory_space<vmem>>) attributes {dimension_semantics = [#tpu.dimension_semantics<parallel>, #tpu.dimension_semantics<parallel>], iteration_bounds = array<i64: 2, 1>, scalar_prefetch = 0 : i64, scratch_operands = 0 : i64, tpu.core_type = #tpu.core_type<tc>, window_params = [{transform_indices = @transform_0, window_bounds = array<i64: 1, 24, 72>}, {pipeline_mode = #tpu.pipeline_mode<synchronous>, transform_indices = @transform_1, window_bounds = array<i64: 3, 72, 128>}, {pipeline_mode = #tpu.pipeline_mode<synchronous>, transform_indices = @transform_2, window_bounds = array<i64: 1, 128>}, {transform_indices = @transform_3, window_bounds = array<i64: 1, 16, 128>}]} {
    %c0 = arith.constant 0 : index
    %c0_0 = arith.constant 0 : index
    %0 = vector.load %arg4[%c0, %c0_0] : memref<1x128xf32, #tpu.memory_space<vmem>>, vector<1x128xf32>
    %1 = vector.shape_cast %0 : vector<1x128xf32> to vector<1x128xf32>
    %2 = vector.broadcast %1 : vector<1x128xf32> to vector<16x128xf32>
    %c16_i32 = arith.constant 16 : i32
    %3 = arith.muli %arg1, %c16_i32 : i32
    %4 = tpu.assume_multiple %3, 8 : i32
    %c0_1 = arith.constant 0 : index
    %5 = arith.index_cast %4 : i32 to index
    %c0_2 = arith.constant 0 : index
    %6 = vector.load %arg2[%c0_1, %5, %c0_2] : memref<1x24x72xbf16, #tpu.memory_space<vmem>>, vector<1x24x72xbf16>
    %7 = vector.extract_strided_slice %6 {offsets = [0, 0, 0], sizes = [1, 16, 72], strides = [1, 1, 1]} : vector<1x24x72xbf16> to vector<1x16x72xbf16>
    %8 = vector.shape_cast %7 : vector<1x16x72xbf16> to vector<16x72xbf16>
    %c0_3 = arith.constant 0 : index
    %c0_4 = arith.constant 0 : index
    %c0_5 = arith.constant 0 : index
    %9 = vector.load %arg3[%c0_3, %c0_4, %c0_5] : memref<3x72x128xbf16, #tpu.memory_space<vmem>>, vector<1x72x128xbf16>
    %10 = vector.shape_cast %9 : vector<1x72x128xbf16> to vector<72x128xbf16>
    %cst = arith.constant dense<0.000000e+00> : vector<16x128xf32>
    %11 = tpu.matmul %8, %10, %cst {dimension_numbers = #tpu.dot_dimension_numbers<[1], [0], [0], [1], [0, 0, 1, 1], [], []>} : vector<16x72xbf16>, vector<72x128xbf16>, vector<16x128xf32> -> vector<16x128xf32>
    %12 = arith.addf %2, %11 : vector<16x128xf32>
    %13 = vector.extract_strided_slice %6 {offsets = [0, 1, 0], sizes = [1, 16, 72], strides = [1, 1, 1]} : vector<1x24x72xbf16> to vector<1x16x72xbf16>
    %14 = vector.shape_cast %13 : vector<1x16x72xbf16> to vector<16x72xbf16>
    %c1 = arith.constant 1 : index
    %c0_6 = arith.constant 0 : index
    %c0_7 = arith.constant 0 : index
    %15 = vector.load %arg3[%c1, %c0_6, %c0_7] : memref<3x72x128xbf16, #tpu.memory_space<vmem>>, vector<1x72x128xbf16>
    %16 = vector.shape_cast %15 : vector<1x72x128xbf16> to vector<72x128xbf16>
    %cst_8 = arith.constant dense<0.000000e+00> : vector<16x128xf32>
    %17 = tpu.matmul %14, %16, %cst_8 {dimension_numbers = #tpu.dot_dimension_numbers<[1], [0], [0], [1], [0, 0, 1, 1], [], []>} : vector<16x72xbf16>, vector<72x128xbf16>, vector<16x128xf32> -> vector<16x128xf32>
    %18 = arith.addf %12, %17 : vector<16x128xf32>
    %19 = vector.extract_strided_slice %6 {offsets = [0, 2, 0], sizes = [1, 16, 72], strides = [1, 1, 1]} : vector<1x24x72xbf16> to vector<1x16x72xbf16>
    %20 = vector.shape_cast %19 : vector<1x16x72xbf16> to vector<16x72xbf16>
    %c2 = arith.constant 2 : index
    %c0_9 = arith.constant 0 : index
    %c0_10 = arith.constant 0 : index
    %21 = vector.load %arg3[%c2, %c0_9, %c0_10] : memref<3x72x128xbf16, #tpu.memory_space<vmem>>, vector<1x72x128xbf16>
    %22 = vector.shape_cast %21 : vector<1x72x128xbf16> to vector<72x128xbf16>
    %cst_11 = arith.constant dense<0.000000e+00> : vector<16x128xf32>
    %23 = tpu.matmul %20, %22, %cst_11 {dimension_numbers = #tpu.dot_dimension_numbers<[1], [0], [0], [1], [0, 0, 1, 1], [], []>} : vector<16x72xbf16>, vector<72x128xbf16>, vector<16x128xf32> -> vector<16x128xf32>
    %24 = arith.addf %18, %23 : vector<16x128xf32>
    %cst_12 = arith.constant 0.000000e+00 : f32
    %25 = vector.broadcast %cst_12 : f32 to vector<16x128xf32>
    %26 = arith.maximumf %24, %25 : vector<16x128xf32>
    %27 = vector.shape_cast %26 : vector<16x128xf32> to vector<1x16x128xf32>
    %c0_13 = arith.constant 0 : index
    %c0_14 = arith.constant 0 : index
    %c0_15 = arith.constant 0 : index
    %28 = vector.load %arg5[%c0_13, %c0_14, %c0_15] : memref<1x16x128xf32, #tpu.memory_space<vmem>>, vector<1x16x128xf32>
    tpu.vector_store %arg5[%c0_13, %c0_14, %c0_15], %27 {strides = array<i32>} : memref<1x16x128xf32, #tpu.memory_space<vmem>>, vector<1x16x128xf32>,
    return
  }
  func.func @transform_0(%arg0: i32, %arg1: i32) -> (i32, i32, i32) {
    %c0_i32 = arith.constant 0 : i32
    %c0_i32_0 = arith.constant 0 : i32
    %c0_i32_1 = arith.constant 0 : i32
    return %arg0, %c0_i32, %c0_i32_0 : i32, i32, i32
  }
  func.func @transform_1(%arg0: i32, %arg1: i32) -> (i32, i32, i32) {
    %c0_i32 = arith.constant 0 : i32
    %c0_i32_0 = arith.constant 0 : i32
    %c0_i32_1 = arith.constant 0 : i32
    %c0_i32_2 = arith.constant 0 : i32
    return %c0_i32, %c0_i32_0, %c0_i32_1 : i32, i32, i32
  }
  func.func @transform_2(%arg0: i32, %arg1: i32) -> (i32, i32) {
    %c0_i32 = arith.constant 0 : i32
    %c0_i32_0 = arith.constant 0 : i32
    %c0_i32_1 = arith.constant 0 : i32
    return %c0_i32, %c0_i32_0 : i32, i32
  }
  func.func @transform_3(%arg0: i32, %arg1: i32) -> (i32, i32, i32) {
    %c0_i32 = arith.constant 0 : i32
    %c0_i32_0 = arith.constant 0 : i32
    return %arg0, %arg1, %c0_i32 : i32, i32, i32
  }
}

module attributes {stable_mosaic.version = 11 : i64} {
  func.func @_conv_block_kernel(%arg0: i32, %arg1: i32, %arg2: memref<1x24x72xbf16, #tpu.memory_space<vmem>>, %arg3: memref<3x72x128xbf16, #tpu.memory_space<vmem>>, %arg4: memref<1x128xf32, #tpu.memory_space<vmem>>, %arg5: memref<1x16x128xf32, #tpu.memory_space<vmem>>) attributes {dimension_semantics = [#tpu.dimension_semantics<parallel>, #tpu.dimension_semantics<parallel>], iteration_bounds = array<i64: 2, 1>, scalar_prefetch = 0 : i64, scratch_operands = 0 : i64, tpu.core_type = #tpu.core_type<tc>, window_params = [{transform_indices = @transform_0, window_bounds = array<i64: 1, 24, 72>}, {pipeline_mode = #tpu.pipeline_mode<synchronous>, transform_indices = @transform_1, window_bounds = array<i64: 3, 72, 128>}, {pipeline_mode = #tpu.pipeline_mode<synchronous>, transform_indices = @transform_2, window_bounds = array<i64: 1, 128>}, {transform_indices = @transform_3, window_bounds = array<i64: 1, 16, 128>}]} {
    %c0 = arith.constant 0 : index
    %c0_0 = arith.constant 0 : index
    %0 = vector.load %arg4[%c0, %c0_0] : memref<1x128xf32, #tpu.memory_space<vmem>>, vector<1x128xf32>
    %1 = vector.shape_cast %0 : vector<1x128xf32> to vector<1x128xf32>
    %2 = vector.broadcast %1 : vector<1x128xf32> to vector<16x128xf32>
    %c16_i32 = arith.constant 16 : i32
    %3 = arith.muli %arg1, %c16_i32 : i32
    %4 = tpu.assume_multiple %3, 8 : i32
    %c0_1 = arith.constant 0 : index
    %5 = arith.index_cast %4 : i32 to index
    %c0_2 = arith.constant 0 : index
    %6 = vector.load %arg2[%c0_1, %5, %c0_2] : memref<1x24x72xbf16, #tpu.memory_space<vmem>>, vector<1x24x72xbf16>
    %7 = vector.extract_strided_slice %6 {offsets = [0, 0, 0], sizes = [1, 16, 72], strides = [1, 1, 1]} : vector<1x24x72xbf16> to vector<1x16x72xbf16>
    %8 = vector.shape_cast %7 : vector<1x16x72xbf16> to vector<16x72xbf16>
    %c0_3 = arith.constant 0 : index
    %c0_4 = arith.constant 0 : index
    %c0_5 = arith.constant 0 : index
    %9 = vector.load %arg3[%c0_3, %c0_4, %c0_5] : memref<3x72x128xbf16, #tpu.memory_space<vmem>>, vector<1x72x128xbf16>
    %10 = vector.shape_cast %9 : vector<1x72x128xbf16> to vector<72x128xbf16>
    %cst = arith.constant dense<0.000000e+00> : vector<16x128xf32>
    %11 = tpu.matmul %8, %10, %cst {dimension_numbers = #tpu.dot_dimension_numbers<[1], [0], [0], [1], [0, 0, 1, 1], [], []>} : vector<16x72xbf16>, vector<72x128xbf16>, vector<16x128xf32> -> vector<16x128xf32>
    %12 = arith.addf %2, %11 : vector<16x128xf32>
    %13 = vector.extract_strided_slice %6 {offsets = [0, 1, 0], sizes = [1, 16, 72], strides = [1, 1, 1]} : vector<1x24x72xbf16> to vector<1x16x72xbf16>
    %14 = vector.shape_cast %13 : vector<1x16x72xbf16> to vector<16x72xbf16>
    %c1 = arith.constant 1 : index
    %c0_6 = arith.constant 0 : index
    %c0_7 = arith.constant 0 : index
    %15 = vector.load %arg3[%c1, %c0_6, %c0_7] : memref<3x72x128xbf16, #tpu.memory_space<vmem>>, vector<1x72x128xbf16>
    %16 = vector.shape_cast %15 : vector<1x72x128xbf16> to vector<72x128xbf16>
    %cst_8 = arith.constant dense<0.000000e+00> : vector<16x128xf32>
    %17 = tpu.matmul %14, %16, %cst_8 {dimension_numbers = #tpu.dot_dimension_numbers<[1], [0], [0], [1], [0, 0, 1, 1], [], []>} : vector<16x72xbf16>, vector<72x128xbf16>, vector<16x128xf32> -> vector<16x128xf32>
    %18 = arith.addf %12, %17 : vector<16x128xf32>
    %19 = vector.extract_strided_slice %6 {offsets = [0, 2, 0], sizes = [1, 16, 72], strides = [1, 1, 1]} : vector<1x24x72xbf16> to vector<1x16x72xbf16>
    %20 = vector.shape_cast %19 : vector<1x16x72xbf16> to vector<16x72xbf16>
    %c2 = arith.constant 2 : index
    %c0_9 = arith.constant 0 : index
    %c0_10 = arith.constant 0 : index
    %21 = vector.load %arg3[%c2, %c0_9, %c0_10] : memref<3x72x128xbf16, #tpu.memory_space<vmem>>, vector<1x72x128xbf16>
    %22 = vector.shape_cast %21 : vector<1x72x128xbf16> to vector<72x128xbf16>
    %cst_11 = arith.constant dense<0.000000e+00> : vector<16x128xf32>
    %23 = tpu.matmul %20, %22, %cst_11 {dimension_numbers = #tpu.dot_dimension_numbers<[1], [0], [0], [1], [0, 0, 1, 1], [], []>} : vector<16x72xbf16>, vector<72x128xbf16>, vector<16x128xf32> -> vector<16x128xf32>
    %24 = arith.addf %18, %23 : vector<16x128xf32>
    %cst_12 = arith.constant 0.000000e+00 : f32
    %25 = vector.broadcast %cst_12 : f32 to vector<16x128xf32>
    %26 = arith.maximumf %24, %25 : vector<16x128xf32>
    %27 = vector.shape_cast %26 : vector<16x128xf32> to vector<1x16x128xf32>
    %c0_13 = arith.constant 0 : index
    %c0_14 = arith.constant 0 : index
    %c0_15 = arith.constant 0 : index
    %28 = vector.load %arg5[%c0_13, %c0_14, %c0_15] : memref<1x16x128xf32, #tpu.memory_space<vmem>>, vector<1x16x128xf32>
    tpu.vector_store %arg5[%c0_13, %c0_14, %c0_15], %27 {strides = array<i32>} : memref<1x16x128xf32, #tpu.memory_space<vmem>>, vector<1x16x128xf32>,
    return
  }
  func.func @transform_0(%arg0: i32, %arg1: i32) -> (i32, i32, i32) {
    %c0_i32 = arith.constant 0 : i32
    %c0_i32_0 = arith.constant 0 : i32
    %c0_i32_1 = arith.constant 0 : i32
    return %arg0, %c0_i32, %c0_i32_0 : i32, i32, i32
  }
  func.func @transform_1(%arg0: i32, %arg1: i32) -> (i32, i32, i32) {
    %c0_i32 = arith.constant 0 : i32
    %c0_i32_0 = arith.constant 0 : i32
    %c0_i32_1 = arith.constant 0 : i32
    %c0_i32_2 = arith.constant 0 : i32
    return %c0_i32, %c0_i32_0, %c0_i32_1 : i32, i32, i32
  }
  func.func @transform_2(%arg0: i32, %arg1: i32) -> (i32, i32) {
    %c0_i32 = arith.constant 0 : i32
    %c0_i32_0 = arith.constant 0 : i32
    %c0_i32_1 = arith.constant 0 : i32
    return %c0_i32, %c0_i32_0 : i32, i32
  }
  func.func @transform_3(%arg0: i32, %arg1: i32) -> (i32, i32, i32) {
    %c0_i32 = arith.constant 0 : i32
    %c0_i32_0 = arith.constant 0 : i32
    return %arg0, %arg1, %c0_i32 : i32, i32, i32
  }
}

</mosaic_0001>

<bundles_post_ra>
// kernel: tpu_custom_call.1
= control target key start
LH: loop header
LB: loop body
LE: loop exit
PB: predicated region body
PF: predicated region fallthrough
CT: control target
= control target key end

     0   :  { %8 = vsyncpa [#allocation3], 0  ;;  %s1262_s0 = inlined_call_operand.hbm [shape: bf16[2,24,72], index: 0, kind: input, shape index: {}]   ;;  %s1263_s1 = inlined_call_operand.hbm [shape: bf16[3,72,128], index: 1, kind: input, shape index: {}]   ;;  %s1264_s2 = inlined_call_operand.vmem [shape: f32[1,128], index: 2, kind: input, shape index: {}]   ;;  %s1265_s3 = inlined_call_operand.hbm [shape: f32[2,16,128], index: 3, kind: output, shape index: {}]  }
   0x1   :  { %10 = vsyncpa [#allocation3 + $0x1], 0 }
   0x2   :  { %11 = vsyncpa [#allocation6], 0 }
   0x3   :  { %12 = vsyncpa [#allocation4], 0 }
   0x4   :  { %14 = vsyncpa [#allocation4 + $0x1], 0  ;;  %s1012_s12 = smov 0   ;;  %s1014_s13 = smov 0  }
   0x5   :  { %s1016_s14 = smov 0   ;;  %s1018_s15 = smov 0  }
   0x6   :  { %s1020_s16 = smov 0   ;;  %s1022_s17 = smov 0  }
   0x7 LB: > { %s634_s18 = sadd.s32 4294967295, %s981_s17   ;;  %s635_s19 = sadd.s32 4294967294, %s981_s17   ;;  %s981_s17 = sphi %s1022_s17, %s20_s17   ;;  %s977_s16 = sphi %s1020_s16, %s1288_s16   ;;  %s973_s15 = sphi %s1018_s15, %s1287_s15   ;;  %s969_s14 = sphi %s1016_s14, %s1286_s14   ;;  %s965_s13 = sphi %s1014_s13, %s1285_s13   ;;  %s961_s12 = sphi %s1012_s12, %s1284_s12  }
   0x8   : > { %p52_p0 = scmp.ne.s32.totalorder %s965_s13, %s961_s12  ;;  %p1046_p1 = scmp.eq.s32.totalorder %s634_s18, 0 }
   0x9   : > { %p1050_p2 = scmp.eq.s32.totalorder %s634_s18, 1  ;;  %p126_p3 = scmp.eq.s32.totalorder %s635_s19, 1 }
   0xa   : > { %s1270_s20 = scalar_select %p1046_p1, 1, 0 }
   0xb   : > { %s1271_s21 = scalar_select %p1050_p2, 1, 0 }
   0xc   : > { %p1056_p4 = por %p1046_p1, %p52_p0  ;;  %p636_p5 = scmp.ge.s32.totalorder %s981_s17, 1 }
   0xd   : > { %p1061_p6 = por %p126_p3, %p52_p0  ;;  %p133_p7 = scmp.lt.s32.totalorder %s981_s17, 3 }
   0xe   : > { %s1272_s22 = scalar_select %p1056_p4, 1, 0 }
   0xf   : > { %s1273_s23 = scalar_select %p1061_p6, 1, 0 }
  0x10   : > { %p1066_p8 = pnand %p636_p5, %p133_p7  ;;  %s983_s25 = smov [#allocation5]  }
  0x11   : > { %s145_s26 = sshll.u32 %s983_s25, 4  ;;  %s32_s28 = sadd.s32 1, %s977_s16  ;;  %s146_s26 = int_to_ptr.vmem [resolvable:$true] %s145_s26 }
  0x12   : > { %s1274_s24 = scalar_select %p1066_p8, 1, 0 }
  0x13   : > { %p749_p9 = pneg %p1066_p8  ;;  %s837_s4 = scalar_lea.hbm %s1263_s1, 1728 }
  0x14   : > { %p838_p12 = scmp.ne.s32.totalorder %s1263_s1, %s837_s4  ;;  %p844_p5 = scmp.lt.u32.totalorder %s837_s4, %s1263_s1 }
  0x15   : > { %p1075_p11 = pnand %p749_p9, %p1046_p1 }
  0x17   : > { %p839_p13 = pneg %p1075_p11 }
  0x19   : > { %p840_p0 = pnand %p839_p13, %p838_p12 }
  0x1b   : > { %p841_p3 = pneg %p840_p0 }
  0x1d   : > { %p846_p7 = pnand %p844_p5, %p841_p3 }
  0x1f   : > { %849 = shalt.err (!%p846_p7)
}
  0x20   : > { %s850_s9 = scalar_lea.vmem %s146_s26, 1728  ;;  %p858_p1 = scmp.lt.s32.totalorder %s146_s26, %s146_s26 }
  0x21   : > { %p851_p9 = scmp.ne.s32.totalorder %s146_s26, %s850_s9  ;;  %p859_p4 = scmp.lt.s32.totalorder %s850_s9, %s850_s9 }
  0x23   : > { %p853_p10 = pnand %p851_p9, %p839_p13  ;;  %p860_p8 = por %p859_p4, %p858_p1 }
  0x25   : > { %p854_p6 = pneg %p853_p10 }
  0x27   : > { %p861_p2 = pnand %p860_p8, %p854_p6 }
  0x29   : > { %864 = shalt.err (!%p861_p2)
}
  0x2a   : > { %s984_s10 = smov 64   ;;  %s985_s11 = smov 4  }
  0x2b   : > { %752 = dma.hbm_to_vmem [thread:$0]  (!%p1075_p11), %s1263_s1, 1728, %s146_s26, [#allocation6], %s984_s10, %s984_s10, %s985_s11  }
  0x2c   : > { %p34_p1 = scmp.ge.s32.totalorder %s32_s28, 2  ;;  %s39_s25 = sadd.s32 1, %s969_s14 }
  0x2d   : > { %p46_p2 = scmp.ne.s32.totalorder %s969_s14, %s965_s13  ;;  %p47_p4 = scmp.eq.s32.totalorder %s981_s17, 0 }
  0x2e   : > { %s1290_s28 = smov (%p34_p1, %s32_s28), 0  ;;  %p1276_p8 = scmp.ne.s32.totalorder %s1271_s21, 0 }
  0x2f   : > { %p48_p6 = por %p47_p4, %p46_p2  ;;  %s36_s27 = ssub.s32 %s977_s16, %s1290_s28 }
  0x30   : > { %p1107_p10 = por %p1276_p8, %p46_p2  ;;  %p762_p12 = scmp.lt.s32.totalorder %s981_s17, 2 }
  0x31   : > { %p37_p13 = scmp.eq.s32.totalorder %s36_s27, 0  ;;  %s162_s30 = sand.u32 1, %s969_s14  }
  0x32   : > { %s738_s4 = smul.u32 12, %s162_s30  ;;  %p1119_p11 = pnand %p762_p12, %p48_p6 }
  0x33   : > { %s1116_s5 = scalar_select %p37_p13, %s969_s14, %s39_s25  }
  0x34   : > { %s739_s26 = smul.u32 192, %s977_s16  ;;  %s166_s6 = scalar_lea.vmem [#allocation2], %s738_s4 }
  0x35   : > { %s173_s7 = sshll.u32 %s166_s6, 4  ;;  %s1130_s19 = scalar_lea.sflag [#allocation3], %s162_s30  ;;  %s1128_s7 = int_to_ptr.vmem [resolvable:$true] %s173_s7 }
  0x36   : > { %s1126_s18 = scalar_lea.hbm %s1262_s0, %s739_s26  ;;  %p867_p3 = pneg %p1119_p11 }
  0x37   : > { %s865_s25 = scalar_lea.hbm %s1126_s18, 192  ;;  %s870_s26 = scalar_lea.hbm %s1262_s0, 384 }
  0x38   : > { %p866_p0 = scmp.ne.s32.totalorder %s1126_s18, %s865_s25  ;;  %p871_p9 = scmp.lt.u32.totalorder %s1126_s18, %s1262_s0 }
  0x39   : > { %p872_p1 = scmp.lt.u32.totalorder %s870_s26, %s865_s25  ;;  %p874_p4 = scmp.lt.u32.totalorder %s865_s25, %s1126_s18 }
  0x3a   : > { %p868_p5 = pnand %p867_p3, %p866_p0 }
  0x3b   : > { %p873_p2 = por %p872_p1, %p871_p9 }
  0x3c   : > { %p869_p7 = pneg %p868_p5 }
  0x3d   : > { %p875_p6 = por %p874_p4, %p873_p2 }
  0x3f   : > { %p876_p8 = pnand %p875_p6, %p869_p7 }
  0x41   : > { %879 = shalt.err (!%p876_p8)
}
  0x42   : > { %s880_s30 = scalar_lea.vmem %s1128_s7, 192  ;;  %s986_s21 = smov [#allocation2]  }
  0x43   : > { %p881_p12 = scmp.ne.s32.totalorder %s1128_s7, %s880_s30  ;;  %s885_s27 = sshll.u32 %s986_s21, 4  ;;  %s886_s27 = int_to_ptr.vmem [resolvable:$false] %s885_s27 }
  0x44   : > { %s887_s4 = scalar_lea.vmem %s886_s27, 384  ;;  %p888_p5 = scmp.lt.s32.totalorder %s1128_s7, %s886_s27 }
  0x45   : > { %p883_p13 = pnand %p881_p12, %p867_p3  ;;  %p889_p9 = scmp.lt.s32.totalorder %s887_s4, %s880_s30 }
  0x47   : > { %p884_p0 = pneg %p883_p13  ;;  %p890_p1 = por %p889_p9, %p888_p5 }
  0x49   : > { %p891_p2 = pnand %p890_p1, %p884_p0 }
  0x4b   : > { %894 = shalt.err (!%p891_p2)
}
  0x4c   : > { %756 = dma.hbm_to_vmem [thread:$0]  (!%p1119_p11), %s1126_s18, 192, %s1128_s7, %s1130_s19, %s984_s10, %s984_s10, %s985_s11  }
  0x4d   : > { %p1279_p3 = scmp.ne.s32.totalorder %s1274_s24, 0 }
  0x4e   : > { %s1164_s25 = sand.u32 (!%p1279_p3), 1, %s965_s13   ;;  %p1280_p7 = scmp.ne.s32.totalorder (!%p1279_p3), %s1272_s22, 0 }
  0x4f   : > { %185 = sbr.rel (%p1279_p3) target bundleno = 365 (0x16d), region = 32  ;;  %s188_s6 = scalar_lea.sflag (!%p1279_p3), [#allocation3], %s1164_s25 }
  0x50   : > { %s740_s26 = smul.u32 (!%p1279_p3), 12, %s1164_s25 }
  0x52   : > { %s191_s9 = scalar_lea.vmem (!%p1279_p3), [#allocation2], %s740_s26 }
  0x56   : > { %948 = dma.done.wait (%p1280_p7), %s188_s6, 192  }
  0x57   : > { %950 = vsyncadd (%p1280_p7), %s188_s6, 4294967104  ;;  %p1281_p4 = scmp.ne.s32.totalorder %s1270_s20, 0 }
  0x59   : > { %952 = dma.done.wait (%p1281_p4), [#allocation6], 1728  }
  0x5a   : > { %954 = vsyncadd (%p1281_p4), [#allocation6], 4294965568  ;;  %v987_v0 = vmov 0.0   ;;  %vm988_vm0 = vmmov 0   ;;  %v820_v1 = vld [vmem:[#allocation5 + $0x24] sm:$0xff]   ;;  %v821_v2 = vld [vmem:[#allocation5 + $0x2c] sm:$0xff]  }
  0x5b   : > { %702 = vmatprep.subr.bf16.mxu0 %v987_v0  ;;  %688 = vmatprep.subr.bf16.mxu1 %v987_v0  ;;  %v824_v3 = vld [vmem:[#allocation5] sm:$0xff]   ;;  %v822_v4 = vld [vmem:[#allocation5 + $0x34] sm:$0xff]   ;;  %v826_v5 = vld [vmem:[#allocation5 + $0x8] sm:$0xff]   ;;  %vm280_vm1 = vcmask 1043456   ;;  %vm340_vm2 = vsmask.f32 7424 }
  0x5c   : > { %712 = vmatprep.mubr.msk.bf16.mxu0 %vm988_vm0, %v987_v0  ;;  %698 = vmatprep.mubr.msk.bf16.mxu1 %vm988_vm0, %v987_v0  ;;  %v827_v6 = vld [vmem:[%s191_s9] sm:$0xff]   ;;  %v823_v7 = vld [vmem:[#allocation5 + $0x3c] sm:$0xff]   ;;  %v825_v9 = vld [vmem:[#allocation5 + $0x44] ss:$0 sps:$4 sm:$0xff]   ;;  %vm276_vm3 = vcmask 588800   ;;  %vm438_vm4 = vcmask 1046528  }
  0x5d   : > { %703 = vmatpush3.bf16.msra.mxu0 %v820_v1  ;;  %689 = vmatpush3.bf16.msra.mxu1 %v824_v3  ;;  %v828_v8 = vld [vmem:[%s191_s9 + $0x8] ss:$0 sps:$4 sm:$0xff]   ;;  %v341_v10 = vshrl.u32 %v827_v6, 16  ;;  %v343_v11 = vshll.u32 %v827_v6, 16  ;;  %v383_v18 = vsel %vm280_vm1, %v825_v9, 0  ;;  %v829_v21 = vld [vmem:[#allocation5 + $0x48] sm:$0xff]  }
  0x5e   : > { %704 = vmatprep.subr.bf16.mxu0 %v987_v0  ;;  %690 = vmatprep.subr.bf16.mxu1 %v987_v0  ;;  %v348_v12 = vshll.u32 %v828_v8, 16  ;;  %v830_v13 = vld [vmem:[#allocation5 + $0x10] sm:$0xff]   ;;  %v832_v17 = vld [vmem:[#allocation5 + $0x18] sm:$0xff]   ;;  %v834_v19 = vld [vmem:[#allocation5 + $0x20] ss:$0 sps:$4 sm:$0xff]   ;;  %v439_v27 = vrot.slane %v827_v6, 1 }
  0x5f   : > { %v345_v14 = vrot.slane %v343_v11, 1  ;;  %v282_v22 = vsel %vm280_vm1, %v834_v19, 0  ;;  %v831_v23 = vld [vmem:[#allocation5 + $0x50] sm:$0xff]   ;;  %v833_v24 = vld [vmem:[#allocation5 + $0x58] sm:$0xff]   ;;  %v835_v25 = vld [vmem:[#allocation5 + $0x60] sm:$0xff]   ;;  %v440_v28 = vrot.slane %v828_v8, 1 }
  0x60   : > { %v350_v16 = vrot.slane %v348_v12, 1  ;;  %v836_v26 = vld [vmem:[#allocation5 + $0x68] ss:$0 sps:$4 sm:$0xff]   ;;  %s642_s24 = sshll.u32 %s1164_s25, 4  ;;  %s669_s7 = sshll.u32 %s973_s15, 8 }
  0x61   : > { %705 = vmatpush3.bf16.msra.mxu0 %v821_v2  ;;  %691 = vmatpush3.bf16.msra.mxu1 %v826_v5  ;;  %v346_v15 = vor.u32 %v345_v14, %v341_v10  ;;  %v473_v29 = vsel %vm280_vm1, %v836_v26, 0  ;;  %v441_v30 = vsel %vm438_vm4, %v439_v27, %v440_v28  ;;  %v643_v35 = vld [vmem:[%s1264_s2] ss:$0 sm:$0xff]  ;;  %s217_s10 = scalar_lea.vmem [#allocation7], %s642_s24  ;;  %s1213_s19 = scalar_lea.hbm %s1265_s3, %s669_s7 }
  0x62   : > { %706 = vmatprep.subr.bf16.mxu0 %v987_v0  ;;  %692 = vmatprep.subr.bf16.mxu1 %v987_v0  ;;  %s538_s11 = sshll.u32 %s217_s10, 4  ;;  %s523_s30 = scalar_lea.sflag [#allocation4], %s1164_s25  ;;  %s1208_s11 = int_to_ptr.vmem [resolvable:$true] %s538_s11 }
  0x63   : > { %v351_v20 = vsel %vm340_vm2, %v346_v15, %v350_v16  ;;  %s895_s21 = scalar_lea.vmem %s1208_s11, 256  ;;  %s989_s15 = smov [#allocation7]  }
  0x64   : > { %p896_p11 = scmp.ne.s32.totalorder %s1208_s11, %s895_s21  ;;  %s899_s27 = sshll.u32 %s989_s15, 4  ;;  %s900_s27 = int_to_ptr.vmem [resolvable:$false] %s899_s27 }
  0x65   : > { %707 = vmatpush3.bf16.msra.mxu0 %v822_v4  ;;  %693 = vmatpush3.bf16.msra.mxu1 %v830_v13  ;;  %s901_s4 = scalar_lea.vmem %s900_s27, 512  ;;  %p902_p12 = scmp.lt.s32.totalorder %s1208_s11, %s900_s27 }
  0x66   : > { %708 = vmatprep.subr.bf16.mxu0 %v987_v0  ;;  %694 = vmatprep.subr.bf16.mxu1 %v987_v0  ;;  %p897_p6 = pnand %p896_p11, %p1107_p10  ;;  %p903_p13 = scmp.lt.s32.totalorder %s901_s4, %s895_s21 }
  0x68   : > { %p898_p8 = pneg %p897_p6  ;;  %p904_p0 = por %p903_p13, %p902_p12 }
  0x69   : > { %709 = vmatpush3.bf16.msra.mxu0 %v823_v7  ;;  %695 = vmatpush3.bf16.msra.mxu1 %v832_v17 }
  0x6a   : > { %710 = vmatprep.subr.bf16.mxu0 %v987_v0  ;;  %696 = vmatprep.subr.bf16.mxu1 %v987_v0  ;;  %p905_p5 = pnand %p904_p0, %p898_p8 }
  0x6d   : > { %711 = vmatpush3.bf16.msra.mxu0 %v383_v18  ;;  %697 = vmatpush3.bf16.msra.mxu1 %v282_v22 }
  0x6e   : > { %716 = vmatprep.subr.bf16.mxu0 %v987_v0 }
  0x70   : > { %713 = vmatmul.mubr.msk.bf16.vlgmr.msra.gmra.mrb[0].mxu0 %vm276_vm3, %v351_v20  ;;  %699 = vmatmul.mubr.msk.bf16.vlgmr.msra.gmra.mrb[0].mxu1 %vm276_vm3, %v827_v6 }
  0x71   : > { %717 = vmatpush3.bf16.msra.mxu0 %v829_v21  ;;  %726 = vmatprep.mubr.msk.bf16.mxu0 %vm988_vm0, %v987_v0 }
  0x72   : > { %718 = vmatprep.subr.bf16.mxu0 %v987_v0 }
  0x75   : > { %719 = vmatpush3.bf16.msra.mxu0 %v831_v23 }
  0x76   : > { %720 = vmatprep.subr.bf16.mxu0 %v987_v0 }
  0x79   : > { %721 = vmatpush3.bf16.msra.mxu0 %v833_v24 }
  0x7a   : > { %722 = vmatprep.subr.bf16.mxu0 %v987_v0 }
  0x7d   : > { %723 = vmatpush3.bf16.msra.mxu0 %v835_v25 }
  0x7e   : > { %724 = vmatprep.subr.bf16.mxu0 %v987_v0 }
  0x81   : > { %725 = vmatpush3.bf16.msra.mxu0 %v473_v29 }
  0x84   : > { %727 = vmatmul.mubr.msk.bf16.vlgmr.msra.gmra.mrb[0].mxu0 %vm276_vm3, %v441_v30 }
 0x143   : > { %v318_v31 = vpop.f32.mrb[0].mxu1 }
 0x144   : > { %v700_v32 = vpop.f32.mrb[1].mxu1  ;;  %v325_v36 = vadd.f32 %v643_v35, %v318_v31 }
 0x145   : > { %v321_v33 = vpop.f32.mrb[2].mxu1 }
 0x146   : > { %v701_v34 = vpop.f32.mrb[3].mxu1  ;;  %v326_v38 = vadd.f32 %v643_v35, %v321_v33 }
 0x157   : > { %v509_v37 = vpop.f32.mrb[0].mxu0 }
 0x158   : > { %v731_v39 = vadd.f32 %v509_v37, %v325_v36  ;;  %v728_v40 = vpop.f32.mrb[1].mxu0 }
 0x159   : > { %v512_v41 = vpop.f32.mrb[2].mxu0 }
 0x15a   : > { %v518_v42 = vmax.f32 %v731_v39, 0.0  ;;  %v733_v43 = vadd.f32 %v512_v41, %v326_v38  ;;  %v729_v44 = vpop.f32.mrb[3].mxu0 }
 0x15c   : > { %520 = vst [vmem:[%s217_s10] sm:$0xff] %v518_v42  ;;  %v519_v45 = vmax.f32 %v733_v43, 0.0 }
 0x15e   : > { %521 = vst [vmem:[%s217_s10 + $0x8] sm:$0xff] %v519_v45 }
 0x15f   : > { %908 = shalt.err (!%p905_p5)
}
 0x160   : > { %s909_s26 = scalar_lea.hbm %s1213_s19, 256  ;;  %s913_s20 = scalar_lea.hbm %s1265_s3, 512 }
 0x161   : > { %p910_p9 = scmp.ne.s32.totalorder %s1213_s19, %s909_s26  ;;  %p914_p3 = scmp.lt.u32.totalorder %s1213_s19, %s1265_s3 }
 0x162   : > { %p915_p7 = scmp.lt.u32.totalorder %s913_s20, %s909_s26  ;;  %p917_p11 = scmp.lt.u32.totalorder %s909_s26, %s1213_s19 }
 0x163   : > { %p911_p1 = pnand %p910_p9, %p1107_p10 }
 0x164   : > { %p916_p4 = por %p915_p7, %p914_p3 }
 0x165   : > { %p912_p2 = pneg %p911_p1 }
 0x166   : > { %p918_p6 = por %p917_p11, %p916_p4 }
 0x168   : > { %p919_p8 = pnand %p918_p6, %p912_p2 }
 0x16a   : > { %922 = shalt.err (!%p919_p8)
}
 0x16b   : > { %s990_s10 = smov 128   ;;  %s991_s7 = smov 8  }
 0x16c   : > { %747 = dma.vmem_to_hbm [thread:$0]  (%p1107_p10), %s1208_s11, 256, %s1213_s19, %s523_s30, %s990_s10, %s990_s10, %s991_s7  }
 0x16d PF: > { %s553_s8 = sand.u32 1, %s961_s12   ;;  %p1282_p12 = scmp.ne.s32.totalorder %s1273_s23, 0 }
 0x16e   : > { %p1283_p13 = scmp.ge.s32.totalorder %s981_s17, 2  ;;  %s554_s18 = scalar_lea.sflag [#allocation4], %s553_s8 }
 0x170   : > { %p758_p0 = pnand %p1283_p13, %p1282_p12 }
 0x172   : > { %956 = dma.done.wait (!%p758_p0), %s554_s18, 256  }
 0x173   : > { %958 = vsyncadd (!%p758_p0), %s554_s18, 4294967040  ;;  %s20_s17 = sadd.s32 1, %s981_s17   ;;  %s1284_s12 = smov %s965_s13 }
 0x174   : > { %p17_p5 = scmp.ge.s32.totalorder %s20_s17, 4   ;;  %s1285_s13 = smov %s969_s14 }
 0x175   : > { %s1286_s14 = smov %s1116_s5  ;;  %s1287_s15 = smov %s977_s16 }
 0x176   : > { %s1288_s16 = smov %s1290_s28  ;;  %19 = sbr.rel (!%p17_p5) target bundleno = 7 (0x7), region = 84 }
 0x17d   :  { %559 = vsyncpa [#allocation3], 1 }
 0x17e   :  { %561 = vsyncpa [#allocation3 + $0x1], 1 }
 0x17f   :  { %562 = vsyncpa [#allocation6], 1 }
 0x180   :  { %563 = vsyncpa [#allocation4], 1 }
 0x181   :  { %565 = vsyncpa [#allocation4 + $0x1], 1 }

// kernel: tpu_custom_call.1
= control target key start
LH: loop header
LB: loop body
LE: loop exit
PB: predicated region body
PF: predicated region fallthrough
CT: control target
= control target key end

     0   :  { %8 = vsyncpa [#allocation3], 0  ;;  %s1262_s0 = inlined_call_operand.hbm [shape: bf16[2,24,72], index: 0, kind: input, shape index: {}]   ;;  %s1263_s1 = inlined_call_operand.hbm [shape: bf16[3,72,128], index: 1, kind: input, shape index: {}]   ;;  %s1264_s2 = inlined_call_operand.vmem [shape: f32[1,128], index: 2, kind: input, shape index: {}]   ;;  %s1265_s3 = inlined_call_operand.hbm [shape: f32[2,16,128], index: 3, kind: output, shape index: {}]  }
   0x1   :  { %10 = vsyncpa [#allocation3 + $0x1], 0 }
   0x2   :  { %11 = vsyncpa [#allocation6], 0 }
   0x3   :  { %12 = vsyncpa [#allocation4], 0 }
   0x4   :  { %14 = vsyncpa [#allocation4 + $0x1], 0  ;;  %s1012_s12 = smov 0   ;;  %s1014_s13 = smov 0  }
   0x5   :  { %s1016_s14 = smov 0   ;;  %s1018_s15 = smov 0  }
   0x6   :  { %s1020_s16 = smov 0   ;;  %s1022_s17 = smov 0  }
   0x7 LB: > { %s634_s18 = sadd.s32 4294967295, %s981_s17   ;;  %s635_s19 = sadd.s32 4294967294, %s981_s17   ;;  %s981_s17 = sphi %s1022_s17, %s20_s17   ;;  %s977_s16 = sphi %s1020_s16, %s1288_s16   ;;  %s973_s15 = sphi %s1018_s15, %s1287_s15   ;;  %s969_s14 = sphi %s1016_s14, %s1286_s14   ;;  %s965_s13 = sphi %s1014_s13, %s1285_s13   ;;  %s961_s12 = sphi %s1012_s12, %s1284_s12  }
   0x8   : > { %p52_p0 = scmp.ne.s32.totalorder %s965_s13, %s961_s12  ;;  %p1046_p1 = scmp.eq.s32.totalorder %s634_s18, 0 }
   0x9   : > { %p1050_p2 = scmp.eq.s32.totalorder %s634_s18, 1  ;;  %p126_p3 = scmp.eq.s32.totalorder %s635_s19, 1 }
   0xa   : > { %s1270_s20 = scalar_select %p1046_p1, 1, 0 }
   0xb   : > { %s1271_s21 = scalar_select %p1050_p2, 1, 0 }
   0xc   : > { %p1056_p4 = por %p1046_p1, %p52_p0  ;;  %p636_p5 = scmp.ge.s32.totalorder %s981_s17, 1 }
   0xd   : > { %p1061_p6 = por %p126_p3, %p52_p0  ;;  %p133_p7 = scmp.lt.s32.totalorder %s981_s17, 3 }
   0xe   : > { %s1272_s22 = scalar_select %p1056_p4, 1, 0 }
   0xf   : > { %s1273_s23 = scalar_select %p1061_p6, 1, 0 }
  0x10   : > { %p1066_p8 = pnand %p636_p5, %p133_p7  ;;  %s983_s25 = smov [#allocation5]  }
  0x11   : > { %s145_s26 = sshll.u32 %s983_s25, 4  ;;  %s32_s28 = sadd.s32 1, %s977_s16  ;;  %s146_s26 = int_to_ptr.vmem [resolvable:$true] %s145_s26 }
  0x12   : > { %s1274_s24 = scalar_select %p1066_p8, 1, 0 }
  0x13   : > { %p749_p9 = pneg %p1066_p8  ;;  %s837_s4 = scalar_lea.hbm %s1263_s1, 1728 }
  0x14   : > { %p838_p12 = scmp.ne.s32.totalorder %s1263_s1, %s837_s4  ;;  %p844_p5 = scmp.lt.u32.totalorder %s837_s4, %s1263_s1 }
  0x15   : > { %p1075_p11 = pnand %p749_p9, %p1046_p1 }
  0x17   : > { %p839_p13 = pneg %p1075_p11 }
  0x19   : > { %p840_p0 = pnand %p839_p13, %p838_p12 }
  0x1b   : > { %p841_p3 = pneg %p840_p0 }
  0x1d   : > { %p846_p7 = pnand %p844_p5, %p841_p3 }
  0x1f   : > { %849 = shalt.err (!%p846_p7)
}
  0x20   : > { %s850_s9 = scalar_lea.vmem %s146_s26, 1728  ;;  %p858_p1 = scmp.lt.s32.totalorder %s146_s26, %s146_s26 }
  0x21   : > { %p851_p9 = scmp.ne.s32.totalorder %s146_s26, %s850_s9  ;;  %p859_p4 = scmp.lt.s32.totalorder %s850_s9, %s850_s9 }
  0x23   : > { %p853_p10 = pnand %p851_p9, %p839_p13  ;;  %p860_p8 = por %p859_p4, %p858_p1 }
  0x25   : > { %p854_p6 = pneg %p853_p10 }
  0x27   : > { %p861_p2 = pnand %p860_p8, %p854_p6 }
  0x29   : > { %864 = shalt.err (!%p861_p2)
}
  0x2a   : > { %s984_s10 = smov 64   ;;  %s985_s11 = smov 4  }
  0x2b   : > { %752 = dma.hbm_to_vmem [thread:$0]  (!%p1075_p11), %s1263_s1, 1728, %s146_s26, [#allocation6], %s984_s10, %s984_s10, %s985_s11  }
  0x2c   : > { %p34_p1 = scmp.ge.s32.totalorder %s32_s28, 2  ;;  %s39_s25 = sadd.s32 1, %s969_s14 }
  0x2d   : > { %p46_p2 = scmp.ne.s32.totalorder %s969_s14, %s965_s13  ;;  %p47_p4 = scmp.eq.s32.totalorder %s981_s17, 0 }
  0x2e   : > { %s1290_s28 = smov (%p34_p1, %s32_s28), 0  ;;  %p1276_p8 = scmp.ne.s32.totalorder %s1271_s21, 0 }
  0x2f   : > { %p48_p6 = por %p47_p4, %p46_p2  ;;  %s36_s27 = ssub.s32 %s977_s16, %s1290_s28 }
  0x30   : > { %p1107_p10 = por %p1276_p8, %p46_p2  ;;  %p762_p12 = scmp.lt.s32.totalorder %s981_s17, 2 }
  0x31   : > { %p37_p13 = scmp.eq.s32.totalorder %s36_s27, 0  ;;  %s162_s30 = sand.u32 1, %s969_s14  }
  0x32   : > { %s738_s4 = smul.u32 12, %s162_s30  ;;  %p1119_p11 = pnand %p762_p12, %p48_p6 }
  0x33   : > { %s1116_s5 = scalar_select %p37_p13, %s969_s14, %s39_s25  }
  0x34   : > { %s739_s26 = smul.u32 192, %s977_s16  ;;  %s166_s6 = scalar_lea.vmem [#allocation2], %s738_s4 }
  0x35   : > { %s173_s7 = sshll.u32 %s166_s6, 4  ;;  %s1130_s19 = scalar_lea.sflag [#allocation3], %s162_s30  ;;  %s1128_s7 = int_to_ptr.vmem [resolvable:$true] %s173_s7 }
  0x36   : > { %s1126_s18 = scalar_lea.hbm %s1262_s0, %s739_s26  ;;  %p867_p3 = pneg %p1119_p11 }
  0x37   : > { %s865_s25 = scalar_lea.hbm %s1126_s18, 192  ;;  %s870_s26 = scalar_lea.hbm %s1262_s0, 384 }
  0x38   : > { %p866_p0 = scmp.ne.s32.totalorder %s1126_s18, %s865_s25  ;;  %p871_p9 = scmp.lt.u32.totalorder %s1126_s18, %s1262_s0 }
  0x39   : > { %p872_p1 = scmp.lt.u32.totalorder %s870_s26, %s865_s25  ;;  %p874_p4 = scmp.lt.u32.totalorder %s865_s25, %s1126_s18 }
  0x3a   : > { %p868_p5 = pnand %p867_p3, %p866_p0 }
  0x3b   : > { %p873_p2 = por %p872_p1, %p871_p9 }
  0x3c   : > { %p869_p7 = pneg %p868_p5 }
  0x3d   : > { %p875_p6 = por %p874_p4, %p873_p2 }
  0x3f   : > { %p876_p8 = pnand %p875_p6, %p869_p7 }
  0x41   : > { %879 = shalt.err (!%p876_p8)
}
  0x42   : > { %s880_s30 = scalar_lea.vmem %s1128_s7, 192  ;;  %s986_s21 = smov [#allocation2]  }
  0x43   : > { %p881_p12 = scmp.ne.s32.totalorder %s1128_s7, %s880_s30  ;;  %s885_s27 = sshll.u32 %s986_s21, 4  ;;  %s886_s27 = int_to_ptr.vmem [resolvable:$false] %s885_s27 }
  0x44   : > { %s887_s4 = scalar_lea.vmem %s886_s27, 384  ;;  %p888_p5 = scmp.lt.s32.totalorder %s1128_s7, %s886_s27 }
  0x45   : > { %p883_p13 = pnand %p881_p12, %p867_p3  ;;  %p889_p9 = scmp.lt.s32.totalorder %s887_s4, %s880_s30 }
  0x47   : > { %p884_p0 = pneg %p883_p13  ;;  %p890_p1 = por %p889_p9, %p888_p5 }
  0x49   : > { %p891_p2 = pnand %p890_p1, %p884_p0 }
  0x4b   : > { %894 = shalt.err (!%p891_p2)
}
  0x4c   : > { %756 = dma.hbm_to_vmem [thread:$0]  (!%p1119_p11), %s1126_s18, 192, %s1128_s7, %s1130_s19, %s984_s10, %s984_s10, %s985_s11  }
  0x4d   : > { %p1279_p3 = scmp.ne.s32.totalorder %s1274_s24, 0 }
  0x4e   : > { %s1164_s25 = sand.u32 (!%p1279_p3), 1, %s965_s13   ;;  %p1280_p7 = scmp.ne.s32.totalorder (!%p1279_p3), %s1272_s22, 0 }
  0x4f   : > { %185 = sbr.rel (%p1279_p3) target bundleno = 365 (0x16d), region = 32  ;;  %s188_s6 = scalar_lea.sflag (!%p1279_p3), [#allocation3], %s1164_s25 }
  0x50   : > { %s740_s26 = smul.u32 (!%p1279_p3), 12, %s1164_s25 }
  0x52   : > { %s191_s9 = scalar_lea.vmem (!%p1279_p3), [#allocation2], %s740_s26 }
  0x56   : > { %948 = dma.done.wait (%p1280_p7), %s188_s6, 192  }
  0x57   : > { %950 = vsyncadd (%p1280_p7), %s188_s6, 4294967104  ;;  %p1281_p4 = scmp.ne.s32.totalorder %s1270_s20, 0 }
  0x59   : > { %952 = dma.done.wait (%p1281_p4), [#allocation6], 1728  }
  0x5a   : > { %954 = vsyncadd (%p1281_p4), [#allocation6], 4294965568  ;;  %v987_v0 = vmov 0.0   ;;  %vm988_vm0 = vmmov 0   ;;  %v820_v1 = vld [vmem:[#allocation5 + $0x24] sm:$0xff]   ;;  %v821_v2 = vld [vmem:[#allocation5 + $0x2c] sm:$0xff]  }
  0x5b   : > { %702 = vmatprep.subr.bf16.mxu0 %v987_v0  ;;  %688 = vmatprep.subr.bf16.mxu1 %v987_v0  ;;  %v824_v3 = vld [vmem:[#allocation5] sm:$0xff]   ;;  %v822_v4 = vld [vmem:[#allocation5 + $0x34] sm:$0xff]   ;;  %v826_v5 = vld [vmem:[#allocation5 + $0x8] sm:$0xff]   ;;  %vm280_vm1 = vcmask 1043456   ;;  %vm340_vm2 = vsmask.f32 7424 }
  0x5c   : > { %712 = vmatprep.mubr.msk.bf16.mxu0 %vm988_vm0, %v987_v0  ;;  %698 = vmatprep.mubr.msk.bf16.mxu1 %vm988_vm0, %v987_v0  ;;  %v827_v6 = vld [vmem:[%s191_s9] sm:$0xff]   ;;  %v823_v7 = vld [vmem:[#allocation5 + $0x3c] sm:$0xff]   ;;  %v825_v9 = vld [vmem:[#allocation5 + $0x44] ss:$0 sps:$4 sm:$0xff]   ;;  %vm276_vm3 = vcmask 588800   ;;  %vm438_vm4 = vcmask 1046528  }
  0x5d   : > { %703 = vmatpush3.bf16.msra.mxu0 %v820_v1  ;;  %689 = vmatpush3.bf16.msra.mxu1 %v824_v3  ;;  %v828_v8 = vld [vmem:[%s191_s9 + $0x8] ss:$0 sps:$4 sm:$0xff]   ;;  %v341_v10 = vshrl.u32 %v827_v6, 16  ;;  %v343_v11 = vshll.u32 %v827_v6, 16  ;;  %v383_v18 = vsel %vm280_vm1, %v825_v9, 0  ;;  %v829_v21 = vld [vmem:[#allocation5 + $0x48] sm:$0xff]  }
  0x5e   : > { %704 = vmatprep.subr.bf16.mxu0 %v987_v0  ;;  %690 = vmatprep.subr.bf16.mxu1 %v987_v0  ;;  %v348_v12 = vshll.u32 %v828_v8, 16  ;;  %v830_v13 = vld [vmem:[#allocation5 + $0x10] sm:$0xff]   ;;  %v832_v17 = vld [vmem:[#allocation5 + $0x18] sm:$0xff]   ;;  %v834_v19 = vld [vmem:[#allocation5 + $0x20] ss:$0 sps:$4 sm:$0xff]   ;;  %v439_v27 = vrot.slane %v827_v6, 1 }
  0x5f   : > { %v345_v14 = vrot.slane %v343_v11, 1  ;;  %v282_v22 = vsel %vm280_vm1, %v834_v19, 0  ;;  %v831_v23 = vld [vmem:[#allocation5 + $0x50] sm:$0xff]   ;;  %v833_v24 = vld [vmem:[#allocation5 + $0x58] sm:$0xff]   ;;  %v835_v25 = vld [vmem:[#allocation5 + $0x60] sm:$0xff]   ;;  %v440_v28 = vrot.slane %v828_v8, 1 }
  0x60   : > { %v350_v16 = vrot.slane %v348_v12, 1  ;;  %v836_v26 = vld [vmem:[#allocation5 + $0x68] ss:$0 sps:$4 sm:$0xff]   ;;  %s642_s24 = sshll.u32 %s1164_s25, 4  ;;  %s669_s7 = sshll.u32 %s973_s15, 8 }
  0x61   : > { %705 = vmatpush3.bf16.msra.mxu0 %v821_v2  ;;  %691 = vmatpush3.bf16.msra.mxu1 %v826_v5  ;;  %v346_v15 = vor.u32 %v345_v14, %v341_v10  ;;  %v473_v29 = vsel %vm280_vm1, %v836_v26, 0  ;;  %v441_v30 = vsel %vm438_vm4, %v439_v27, %v440_v28  ;;  %v643_v35 = vld [vmem:[%s1264_s2] ss:$0 sm:$0xff]  ;;  %s217_s10 = scalar_lea.vmem [#allocation7], %s642_s24  ;;  %s1213_s19 = scalar_lea.hbm %s1265_s3, %s669_s7 }
  0x62   : > { %706 = vmatprep.subr.bf16.mxu0 %v987_v0  ;;  %692 = vmatprep.subr.bf16.mxu1 %v987_v0  ;;  %s538_s11 = sshll.u32 %s217_s10, 4  ;;  %s523_s30 = scalar_lea.sflag [#allocation4], %s1164_s25  ;;  %s1208_s11 = int_to_ptr.vmem [resolvable:$true] %s538_s11 }
  0x63   : > { %v351_v20 = vsel %vm340_vm2, %v346_v15, %v350_v16  ;;  %s895_s21 = scalar_lea.vmem %s1208_s11, 256  ;;  %s989_s15 = smov [#allocation7]  }
  0x64   : > { %p896_p11 = scmp.ne.s32.totalorder %s1208_s11, %s895_s21  ;;  %s899_s27 = sshll.u32 %s989_s15, 4  ;;  %s900_s27 = int_to_ptr.vmem [resolvable:$false] %s899_s27 }
  0x65   : > { %707 = vmatpush3.bf16.msra.mxu0 %v822_v4  ;;  %693 = vmatpush3.bf16.msra.mxu1 %v830_v13  ;;  %s901_s4 = scalar_lea.vmem %s900_s27, 512  ;;  %p902_p12 = scmp.lt.s32.totalorder %s1208_s11, %s900_s27 }
  0x66   : > { %708 = vmatprep.subr.bf16.mxu0 %v987_v0  ;;  %694 = vmatprep.subr.bf16.mxu1 %v987_v0  ;;  %p897_p6 = pnand %p896_p11, %p1107_p10  ;;  %p903_p13 = scmp.lt.s32.totalorder %s901_s4, %s895_s21 }
  0x68   : > { %p898_p8 = pneg %p897_p6  ;;  %p904_p0 = por %p903_p13, %p902_p12 }
  0x69   : > { %709 = vmatpush3.bf16.msra.mxu0 %v823_v7  ;;  %695 = vmatpush3.bf16.msra.mxu1 %v832_v17 }
  0x6a   : > { %710 = vmatprep.subr.bf16.mxu0 %v987_v0  ;;  %696 = vmatprep.subr.bf16.mxu1 %v987_v0  ;;  %p905_p5 = pnand %p904_p0, %p898_p8 }
  0x6d   : > { %711 = vmatpush3.bf16.msra.mxu0 %v383_v18  ;;  %697 = vmatpush3.bf16.msra.mxu1 %v282_v22 }
  0x6e   : > { %716 = vmatprep.subr.bf16.mxu0 %v987_v0 }
  0x70   : > { %713 = vmatmul.mubr.msk.bf16.vlgmr.msra.gmra.mrb[0].mxu0 %vm276_vm3, %v351_v20  ;;  %699 = vmatmul.mubr.msk.bf16.vlgmr.msra.gmra.mrb[0].mxu1 %vm276_vm3, %v827_v6 }
  0x71   : > { %717 = vmatpush3.bf16.msra.mxu0 %v829_v21  ;;  %726 = vmatprep.mubr.msk.bf16.mxu0 %vm988_vm0, %v987_v0 }
  0x72   : > { %718 = vmatprep.subr.bf16.mxu0 %v987_v0 }
  0x75   : > { %719 = vmatpush3.bf16.msra.mxu0 %v831_v23 }
  0x76   : > { %720 = vmatprep.subr.bf16.mxu0 %v987_v0 }
  0x79   : > { %721 = vmatpush3.bf16.msra.mxu0 %v833_v24 }
  0x7a   : > { %722 = vmatprep.subr.bf16.mxu0 %v987_v0 }
  0x7d   : > { %723 = vmatpush3.bf16.msra.mxu0 %v835_v25 }
  0x7e   : > { %724 = vmatprep.subr.bf16.mxu0 %v987_v0 }
  0x81   : > { %725 = vmatpush3.bf16.msra.mxu0 %v473_v29 }
  0x84   : > { %727 = vmatmul.mubr.msk.bf16.vlgmr.msra.gmra.mrb[0].mxu0 %vm276_vm3, %v441_v30 }
 0x143   : > { %v318_v31 = vpop.f32.mrb[0].mxu1 }
 0x144   : > { %v700_v32 = vpop.f32.mrb[1].mxu1  ;;  %v325_v36 = vadd.f32 %v643_v35, %v318_v31 }
 0x145   : > { %v321_v33 = vpop.f32.mrb[2].mxu1 }
 0x146   : > { %v701_v34 = vpop.f32.mrb[3].mxu1  ;;  %v326_v38 = vadd.f32 %v643_v35, %v321_v33 }
 0x157   : > { %v509_v37 = vpop.f32.mrb[0].mxu0 }
 0x158   : > { %v731_v39 = vadd.f32 %v509_v37, %v325_v36  ;;  %v728_v40 = vpop.f32.mrb[1].mxu0 }
 0x159   : > { %v512_v41 = vpop.f32.mrb[2].mxu0 }
 0x15a   : > { %v518_v42 = vmax.f32 %v731_v39, 0.0  ;;  %v733_v43 = vadd.f32 %v512_v41, %v326_v38  ;;  %v729_v44 = vpop.f32.mrb[3].mxu0 }
 0x15c   : > { %520 = vst [vmem:[%s217_s10] sm:$0xff] %v518_v42  ;;  %v519_v45 = vmax.f32 %v733_v43, 0.0 }
 0x15e   : > { %521 = vst [vmem:[%s217_s10 + $0x8] sm:$0xff] %v519_v45 }
 0x15f   : > { %908 = shalt.err (!%p905_p5)
}
 0x160   : > { %s909_s26 = scalar_lea.hbm %s1213_s19, 256  ;;  %s913_s20 = scalar_lea.hbm %s1265_s3, 512 }
 0x161   : > { %p910_p9 = scmp.ne.s32.totalorder %s1213_s19, %s909_s26  ;;  %p914_p3 = scmp.lt.u32.totalorder %s1213_s19, %s1265_s3 }
 0x162   : > { %p915_p7 = scmp.lt.u32.totalorder %s913_s20, %s909_s26  ;;  %p917_p11 = scmp.lt.u32.totalorder %s909_s26, %s1213_s19 }
 0x163   : > { %p911_p1 = pnand %p910_p9, %p1107_p10 }
 0x164   : > { %p916_p4 = por %p915_p7, %p914_p3 }
 0x165   : > { %p912_p2 = pneg %p911_p1 }
 0x166   : > { %p918_p6 = por %p917_p11, %p916_p4 }
 0x168   : > { %p919_p8 = pnand %p918_p6, %p912_p2 }
 0x16a   : > { %922 = shalt.err (!%p919_p8)
}
 0x16b   : > { %s990_s10 = smov 128   ;;  %s991_s7 = smov 8  }
 0x16c   : > { %747 = dma.vmem_to_hbm [thread:$0]  (%p1107_p10), %s1208_s11, 256, %s1213_s19, %s523_s30, %s990_s10, %s990_s10, %s991_s7  }
 0x16d PF: > { %s553_s8 = sand.u32 1, %s961_s12   ;;  %p1282_p12 = scmp.ne.s32.totalorder %s1273_s23, 0 }
 0x16e   : > { %p1283_p13 = scmp.ge.s32.totalorder %s981_s17, 2  ;;  %s554_s18 = scalar_lea.sflag [#allocation4], %s553_s8 }
 0x170   : > { %p758_p0 = pnand %p1283_p13, %p1282_p12 }
 0x172   : > { %956 = dma.done.wait (!%p758_p0), %s554_s18, 256  }
 0x173   : > { %958 = vsyncadd (!%p758_p0), %s554_s18, 4294967040  ;;  %s20_s17 = sadd.s32 1, %s981_s17   ;;  %s1284_s12 = smov %s965_s13 }
 0x174   : > { %p17_p5 = scmp.ge.s32.totalorder %s20_s17, 4   ;;  %s1285_s13 = smov %s969_s14 }
 0x175   : > { %s1286_s14 = smov %s1116_s5  ;;  %s1287_s15 = smov %s977_s16 }
 0x176   : > { %s1288_s16 = smov %s1290_s28  ;;  %19 = sbr.rel (!%p17_p5) target bundleno = 7 (0x7), region = 84 }
 0x17d   :  { %559 = vsyncpa [#allocation3], 1 }
 0x17e   :  { %561 = vsyncpa [#allocation3 + $0x1], 1 }
 0x17f   :  { %562 = vsyncpa [#allocation6], 1 }
 0x180   :  { %563 = vsyncpa [#allocation4], 1 }
 0x181   :  { %565 = vsyncpa [#allocation4 + $0x1], 1 }

</bundles_post_ra>
